<compile_context>
chip_gen: v7x
topology: tpu7x:2x2x1
jax: 0.10.0
libtpu: 0.0.40
codegen_flags: <defaults>
</compile_context>

<pallas_src>
import functools
import math

import jax
import jax.numpy as jnp
from jax import lax
from jax.experimental import pallas as pl
from jax.experimental.pallas import tpu as pltpu

_LANES = 128
_MIB = 1024 * 1024


def _sublane_multiple(dtype) -> int:
    """Rows per sublane pack: 8 for 4-byte, 16 for 2-byte, 32 for 1-byte dtypes."""
    itemsize = jnp.dtype(dtype).itemsize
    if itemsize >= 4:
        return 8
    if itemsize == 2:
        return 16
    return 32


def _round_up(x: int, m: int) -> int:
    return ((x + m - 1) // m) * m


def _pick_row_tile(n_rows, width, dtype, tile_bytes, min_grid_steps):
    """Byte-budgeted, sublane-aligned row tile that leaves >= min_grid_steps steps."""
    sub = _sublane_multiple(dtype)
    itemsize = jnp.dtype(dtype).itemsize
    tm = max(sub, (int(tile_bytes) // (width * itemsize)) // sub * sub)
    # Keep several grid steps so ("parallel",) can shard rows across TensorCores
    # (v7x has 2 per chip) and the DMA/compute pipeline has work to overlap.
    if n_rows > sub * min_grid_steps:
        tm = min(tm, _round_up(pl.cdiv(n_rows, min_grid_steps), sub))
    tm = min(tm, n_rows)  # tm == n_rows (full extent) is always a legal block dim
    return tm


def _vmem_limit_bytes(tm, width, in_dtype, out_dtype, extra_bytes=0):
    in_tile = tm * width * jnp.dtype(in_dtype).itemsize
    out_tile = tm * width * jnp.dtype(out_dtype).itemsize
    f32_tile = tm * width * 4
    # double-buffered I/O + ~4 f32 tile-sized intermediates + constants + slack.
    needed = 2 * (in_tile + out_tile) + 4 * f32_tile + int(extra_bytes) + (1 << 20)
    # >= 32 MiB lifts the v5e/v6e scoped defaults; <= 48 MiB stays safe on v7x (64 MiB VMEM).
    return int(min(48 * _MIB, max(32 * _MIB, needed)))


def _ln_packed_kernel(x_ref, p_ref, g_ref, b_ref, o_ref, *, eps):
    # x_ref: (tm, W) where each vreg row packs k original rows of length D (W = k*D).
    # p_ref: (W, W) block-diagonal averaging matrix (1/D inside each DxD block).
    x = x_ref[...].astype(jnp.float32)
    p = p_ref[...]
    # Per-group mean / centered variance via the MXU (idle otherwise); each lane
    # ends up holding its own group's statistic, already broadcast.
    mean = jnp.dot(x, p, preferred_element_type=jnp.float32,
                   precision=lax.Precision.HIGHEST)
    xc = x - mean
    var = jnp.dot(xc * xc, p, preferred_element_type=jnp.float32,
                  precision=lax.Precision.HIGHEST)
    inv = pl.reciprocal(jnp.sqrt(var) + eps, approx=False)  # torch spec: eps added to std
    o_ref[...] = (xc * inv * g_ref[...] + b_ref[...]).astype(o_ref.dtype)


def _ln_rowwise_kernel(x_ref, g_ref, b_ref, o_ref, *, eps):
    # x_ref: (tm, D) with D >= 128 (already lane dense).
    x = x_ref[...].astype(jnp.float32)
    mean = jnp.mean(x, axis=-1, keepdims=True)
    xc = x - mean
    var = jnp.mean(xc * xc, axis=-1, keepdims=True)
    inv = pl.reciprocal(jnp.sqrt(var) + eps, approx=False)
    o_ref[...] = (xc * inv * g_ref[...] + b_ref[...]).astype(o_ref.dtype)


def _layer_norm_xla(x, gamma, beta, eps, nd):
    """Plain XLA fusion: used for problems too small to amortize a pallas_call."""
    axes = tuple(range(x.ndim - nd, x.ndim))
    xf = x.astype(jnp.float32)
    mean = jnp.mean(xf, axis=axes, keepdims=True)
    xc = xf - mean
    std = jnp.sqrt(jnp.mean(xc * xc, axis=axes, keepdims=True))
    out = xc / (std + eps) * gamma.astype(jnp.float32) + beta.astype(jnp.float32)
    return out.astype(x.dtype)


def layer_norm(x, gamma, beta, *, eps=1e-6, tile_bytes=2 * _MIB,
               min_pallas_bytes=128 * 1024, max_packed_width=512,
               min_grid_steps=8):
    """x: (..., *normalized_shape); gamma/beta: normalized_shape -> same shape as x."""
    normalized_shape = tuple(gamma.shape)
    nd = len(normalized_shape)
    assert nd >= 1
    assert tuple(beta.shape) == normalized_shape
    assert tuple(x.shape[-nd:]) == normalized_shape

    D = int(math.prod(normalized_shape))
    M = int(math.prod(x.shape[:-nd]))
    itemsize = jnp.dtype(x.dtype).itemsize

    # Tiny problems: pallas_call launch + single-step grid overhead exceeds the
    # data-movement time; let XLA fuse it.
    if M * D * itemsize < min_pallas_bytes:
        return _layer_norm_xla(x, gamma, beta, eps, nd)

    x2d = x.reshape(M, D)  # free: normalized dims are trailing & contiguous
    g = gamma.reshape(D).astype(jnp.float32)
    b = beta.reshape(D).astype(jnp.float32)

    if D < _LANES:
        # Pack k rows per 128-lane vreg row so every load/store is lane dense.
        k = _LANES // math.gcd(D, _LANES)
        W = k * D
        if W > max_packed_width or M % k != 0:
            # Can't pack cleanly: a masked narrow-lane kernel would be slower
            # than the XLA fusion, so don't dispatch Pallas here.
            return _layer_norm_xla(x, gamma, beta, eps, nd)
        Mg = M // k
        xg = x2d.reshape(Mg, W)  # free reshape
        gW = jnp.tile(g, k).reshape(1, W)
        bW = jnp.tile(b, k).reshape(1, W)
        grp = jnp.arange(W, dtype=jnp.int32) // D
        avg = jnp.where(grp[:, None] == grp[None, :],
                        jnp.float32(1.0 / D), jnp.float32(0.0))  # (W, W)

        tm = _pick_row_tile(Mg, W, x.dtype, tile_bytes, min_grid_steps)
        grid = (pl.cdiv(Mg, tm),)
        cost = pl.CostEstimate(
            flops=int(4 * Mg * W * W + 10 * Mg * W),
            transcendentals=int(2 * Mg * W),
            bytes_accessed=int(2 * Mg * W * itemsize + W * W * 4 + 2 * W * 4),
        )
        out2d = pl.pallas_call(
            functools.partial(_ln_packed_kernel, eps=eps),
            out_shape=jax.ShapeDtypeStruct((Mg, W), x.dtype),
            grid_spec=pltpu.PrefetchScalarGridSpec(
                num_scalar_prefetch=0,
                grid=grid,
                in_specs=[
                    pl.BlockSpec((tm, W), lambda i: (i, 0)),
                    pl.BlockSpec((W, W), lambda i: (0, 0)),
                    pl.BlockSpec((1, W), lambda i: (0, 0)),
                    pl.BlockSpec((1, W), lambda i: (0, 0)),
                ],
                out_specs=pl.BlockSpec((tm, W), lambda i: (i, 0)),
            ),
            compiler_params=pltpu.CompilerParams(
                dimension_semantics=("parallel",),
                vmem_limit_bytes=_vmem_limit_bytes(tm, W, x.dtype, x.dtype,
                                                   extra_bytes=W * W * 4),
            ),
            cost_estimate=cost,
        )(xg, avg, gW, bW)
        return out2d.reshape(x.shape)

    # D >= 128: rows are already lane dense; reduce over the lane axis directly.
    tm = _pick_row_tile(M, D, x.dtype, tile_bytes, min_grid_steps)
    grid = (pl.cdiv(M, tm),)
    cost = pl.CostEstimate(
        flops=int(10 * M * D),
        transcendentals=int(2 * M),
        bytes_accessed=int(2 * M * D * itemsize + 2 * D * 4),
    )
    out2d = pl.pallas_call(
        functools.partial(_ln_rowwise_kernel, eps=eps),
        out_shape=jax.ShapeDtypeStruct((M, D), x.dtype),
        grid_spec=pltpu.PrefetchScalarGridSpec(
            num_scalar_prefetch=0,
            grid=grid,
            in_specs=[
                pl.BlockSpec((tm, D), lambda i: (i, 0)),
                pl.BlockSpec((1, D), lambda i: (0, 0)),
                pl.BlockSpec((1, D), lambda i: (0, 0)),
            ],
            out_specs=pl.BlockSpec((tm, D), lambda i: (i, 0)),
        ),
        compiler_params=pltpu.CompilerParams(
            dimension_semantics=("parallel",),
            vmem_limit_bytes=_vmem_limit_bytes(tm, D, x.dtype, x.dtype),
        ),
        cost_estimate=cost,
    )(x2d, g.reshape(1, D), b.reshape(1, D))
    return out2d.reshape(x.shape)


if __name__ == "__main__":
    key = jax.random.PRNGKey(0)
    kx, kg, kb, ks = jax.random.split(key, 4)

    eps = 1e-6
    C = 32
    normalized_shape = (C,)

    gamma = 1.0 + 0.1 * jax.random.normal(kg, normalized_shape, dtype=jnp.float32)
    beta = 0.1 * jax.random.normal(kb, normalized_shape, dtype=jnp.float32)

    def reference(x):
        mean = jnp.mean(x, axis=-1, keepdims=True)
        std = jnp.sqrt(jnp.mean((x - mean) ** 2, axis=-1, keepdims=True))
        return (x - mean) / (std + eps) * gamma + beta

    # 1) Main Pallas path (lane-dense packed kernel): TESTAM-style activations
    #    (batch, nodes, seq_len, channels), normalized over the channel dim.
    N, V, L = 4, 32, 16  # M = 2048 rows -> packed (512, 128) slab, 8-step grid
    x_big = jax.random.normal(kx, (N, V, L, C), dtype=jnp.float32)
    out_big = jax.block_until_ready(layer_norm(x_big, gamma, beta, eps=eps))
    ref_big = reference(x_big)
    assert out_big.shape == x_big.shape
    assert jnp.allclose(out_big, ref_big, atol=1e-5, rtol=1e-5), float(
        jnp.max(jnp.abs(out_big - ref_big)))

    # 2) Same input, tiny tile budget -> ragged last block (masked store path).
    out_rag = jax.block_until_ready(
        layer_norm(x_big, gamma, beta, eps=eps, tile_bytes=24 * 1024))
    assert jnp.allclose(out_rag, ref_big, atol=1e-5, rtol=1e-5), float(
        jnp.max(jnp.abs(out_rag - ref_big)))

    # 3) Very small problem -> XLA-fusion fallback path.
    x_small = jax.random.normal(ks, (2, 16, 8, C), dtype=jnp.float32)
    out_small = jax.block_until_ready(layer_norm(x_small, gamma, beta, eps=eps))
    ref_small = reference(x_small)
    assert jnp.allclose(out_small, ref_small, atol=1e-5, rtol=1e-5), float(
        jnp.max(jnp.abs(out_small - ref_small)))

    print("KERNEL_OK")
</pallas_src>

<mosaic_0001>
module attributes {stable_mosaic.version = 11 : i64} {
  func.func @_ln_packed_kernel(%arg0: i32, %arg1: memref<64x128xf32, #tpu.memory_space<vmem>>, %arg2: memref<128x128xf32, #tpu.memory_space<vmem>>, %arg3: memref<1x128xf32, #tpu.memory_space<vmem>>, %arg4: memref<1x128xf32, #tpu.memory_space<vmem>>, %arg5: memref<64x128xf32, #tpu.memory_space<vmem>>) attributes {dimension_semantics = [#tpu.dimension_semantics<parallel>], iteration_bounds = array<i64: 8>, scalar_prefetch = 0 : i64, scratch_operands = 0 : i64, tpu.core_type = #tpu.core_type<tc>, window_params = [{transform_indices = @transform_0, window_bounds = array<i64: 64, 128>}, {pipeline_mode = #tpu.pipeline_mode<synchronous>, transform_indices = @transform_1, window_bounds = array<i64: 128, 128>}, {pipeline_mode = #tpu.pipeline_mode<synchronous>, transform_indices = @transform_2, window_bounds = array<i64: 1, 128>}, {pipeline_mode = #tpu.pipeline_mode<synchronous>, transform_indices = @transform_3, window_bounds = array<i64: 1, 128>}, {transform_indices = @transform_4, window_bounds = array<i64: 64, 128>}]} {
    %c0 = arith.constant 0 : index
    %c0_0 = arith.constant 0 : index
    %0 = vector.load %arg1[%c0, %c0_0] : memref<64x128xf32, #tpu.memory_space<vmem>>, vector<64x128xf32>
    %c0_1 = arith.constant 0 : index
    %c0_2 = arith.constant 0 : index
    %1 = vector.load %arg2[%c0_1, %c0_2] : memref<128x128xf32, #tpu.memory_space<vmem>>, vector<128x128xf32>
    %cst = arith.constant dense<0.000000e+00> : vector<64x128xf32>
    %2 = tpu.matmul %0, %1, %cst {dimension_numbers = #tpu.dot_dimension_numbers<[1], [0], [0], [1], [0, 0, 1, 1], [], []>, precision = #tpu.contract_precision<fp32>} : vector<64x128xf32>, vector<128x128xf32>, vector<64x128xf32> -> vector<64x128xf32>
    %3 = arith.subf %0, %2 : vector<64x128xf32>
    %4 = arith.mulf %3, %3 : vector<64x128xf32>
    %cst_3 = arith.constant dense<0.000000e+00> : vector<64x128xf32>
    %5 = tpu.matmul %4, %1, %cst_3 {dimension_numbers = #tpu.dot_dimension_numbers<[1], [0], [0], [1], [0, 0, 1, 1], [], []>, precision = #tpu.contract_precision<fp32>} : vector<64x128xf32>, vector<128x128xf32>, vector<64x128xf32> -> vector<64x128xf32>
    %6 = math.sqrt %5 : vector<64x128xf32>
    %cst_4 = arith.constant 9.99999997E-7 : f32
    %7 = vector.broadcast %cst_4 : f32 to vector<64x128xf32>
    %8 = arith.addf %6, %7 : vector<64x128xf32>
    %9 = tpu.reciprocal %8 : vector<64x128xf32> -> vector<64x128xf32>
    %10 = arith.mulf %3, %9 : vector<64x128xf32>
    %c0_5 = arith.constant 0 : index
    %c0_6 = arith.constant 0 : index
    %11 = vector.load %arg3[%c0_5, %c0_6] : memref<1x128xf32, #tpu.memory_space<vmem>>, vector<1x128xf32>
    %12 = vector.broadcast %11 : vector<1x128xf32> to vector<64x128xf32>
    %13 = arith.mulf %10, %12 : vector<64x128xf32>
    %c0_7 = arith.constant 0 : index
    %c0_8 = arith.constant 0 : index
    %14 = vector.load %arg4[%c0_7, %c0_8] : memref<1x128xf32, #tpu.memory_space<vmem>>, vector<1x128xf32>
    %15 = vector.broadcast %14 : vector<1x128xf32> to vector<64x128xf32>
    %16 = arith.addf %13, %15 : vector<64x128xf32>
    %c0_9 = arith.constant 0 : index
    %c0_10 = arith.constant 0 : index
    %17 = vector.load %arg5[%c0_9, %c0_10] : memref<64x128xf32, #tpu.memory_space<vmem>>, vector<64x128xf32>
    tpu.vector_store %arg5[%c0_9, %c0_10], %16 {strides = array<i32>} : memref<64x128xf32, #tpu.memory_space<vmem>>, vector<64x128xf32>,
    return
  }
  func.func @transform_0(%arg0: i32) -> (i32, i32) {
    %c0_i32 = arith.constant 0 : i32
    %c0_i32_0 = arith.constant 0 : i32
    return %arg0, %c0_i32 : i32, i32
  }
  func.func @transform_1(%arg0: i32) -> (i32, i32) {
    %c0_i32 = arith.constant 0 : i32
    %c0_i32_0 = arith.constant 0 : i32
    %c0_i32_1 = arith.constant 0 : i32
    return %c0_i32, %c0_i32_0 : i32, i32
  }
  func.func @transform_2(%arg0: i32) -> (i32, i32) {
    %c0_i32 = arith.constant 0 : i32
    %c0_i32_0 = arith.constant 0 : i32
    %c0_i32_1 = arith.constant 0 : i32
    return %c0_i32, %c0_i32_0 : i32, i32
  }
  func.func @transform_3(%arg0: i32) -> (i32, i32) {
    %c0_i32 = arith.constant 0 : i32
    %c0_i32_0 = arith.constant 0 : i32
    %c0_i32_1 = arith.constant 0 : i32
    return %c0_i32, %c0_i32_0 : i32, i32
  }
  func.func @transform_4(%arg0: i32) -> (i32, i32) {
    %c0_i32 = arith.constant 0 : i32
    %c0_i32_0 = arith.constant 0 : i32
    return %arg0, %c0_i32 : i32, i32
  }
}

</mosaic_0001>

<bundles_post_ra>
// kernel: tpu_custom_call.1
= control target key start
LH: loop header
LB: loop body
LE: loop exit
PB: predicated region body
PF: predicated region fallthrough
CT: control target
= control target key end

     0   :  { %9 = vsyncpa [#allocation3], 0  ;;  %s4931_s0 = inlined_call_operand.hbm [shape: f32[512,128], index: 0, kind: input, shape index: {}]   ;;  %s4932_s1 = inlined_call_operand.hbm [shape: f32[128,128], index: 1, kind: input, shape index: {}]   ;;  %s4933_s2 = inlined_call_operand.vmem [shape: f32[1,128], index: 2, kind: input, shape index: {}]   ;;  %s4934_s3 = inlined_call_operand.vmem [shape: f32[1,128], index: 3, kind: input, shape index: {}]   ;;  %s4935_s4 = inlined_call_operand.hbm [shape: f32[512,128], index: 4, kind: output, shape index: {}]  }
   0x1   :  { %11 = vsyncpa [#allocation3 + $0x1], 0 }
   0x2   :  { %12 = vsyncpa [#allocation6], 0 }
   0x3   :  { %13 = vsyncpa [#allocation4], 0 }
   0x4   :  { %15 = vsyncpa [#allocation4 + $0x1], 0  ;;  %s3927_s15 = smov 0   ;;  %s3929_s16 = smov 0  }
   0x5   :  { %s3931_s17 = smov 0   ;;  %s3933_s18 = smov 0  }
   0x6 LB: > { %s3948_s19 = sadd.s32 4294967295, %s3893_s18   ;;  %s2372_s20 = sadd.s32 4294967294, %s3893_s18   ;;  %s3893_s18 = sphi %s3933_s18, %s5063_s18   ;;  %s3889_s17 = sphi %s3931_s17, %s5062_s17   ;;  %s3885_s16 = sphi %s3929_s16, %s5061_s16   ;;  %s3881_s15 = sphi %s3927_s15, %s5060_s15  }
   0x7   : > { %p41_p0 = scmp.ne.s32.totalorder %s3885_s16, %s3881_s15  ;;  %p4936_p1 = scmp.eq.s32.totalorder %s3948_s19, 0 }
   0x8   : > { %p134_p3 = scmp.eq.s32.totalorder %s2372_s20, 7  ;;  %p2373_p5 = scmp.ge.s32.totalorder %s3893_s18, 1 }
   0x9   : > { %p3957_p4 = por %p4936_p1, %p41_p0  ;;  %p141_p7 = scmp.lt.s32.totalorder %s3893_s18, 9 }
   0xa   : > { %p3962_p6 = por %p134_p3, %p41_p0  ;;  %s3895_s24 = smov [#allocation5]  }
   0xb   : > { %s4983_s21 = scalar_select %p3957_p4, 1, 0 }
   0xc   : > { %s4984_s22 = scalar_select %p3962_p6, 1, 0 }
   0xd   : > { %p3967_p8 = pnand %p2373_p5, %p141_p7  ;;  %s153_s25 = sshll.u32 %s3895_s24, 4  ;;  %s154_s25 = int_to_ptr.vmem [resolvable:$true] %s153_s25 }
   0xe   : > { %s3980_s27 = sadd.s32 1, %s3893_s18   ;;  %s28_s28 = sadd.s32 1, %s3889_s17 }
   0xf   : > { %s4985_s23 = scalar_select %p3967_p8, 1, 0 }
  0x10   : > { %p3680_p9 = pneg %p3967_p8  ;;  %s25_s29 = ssub.s32 %s3893_s18, %s3980_s27 }
  0x11   : > { %s3765_s6 = scalar_lea.hbm %s4932_s1, 2048 }
  0x12   : > { %p3975_p10 = pnand %p3680_p9, %p4936_p1  ;;  %p3766_p11 = scmp.ne.s32.totalorder %s4932_s1, %s3765_s6 }
  0x13   : > { %p3772_p3 = scmp.lt.u32.totalorder %s3765_s6, %s4932_s1 }
  0x14   : > { %p3767_p12 = pneg %p3975_p10 }
  0x16   : > { %p3768_p13 = pnand %p3767_p12, %p3766_p11 }
  0x18   : > { %p3769_p0 = pneg %p3768_p13 }
  0x1a   : > { %p3774_p5 = pnand %p3772_p3, %p3769_p0 }
  0x1c   : > { %3777 = shalt.err (!%p3774_p5)
}
  0x1d   : > { %s3778_s11 = scalar_lea.vmem %s154_s25, 2048  ;;  %p3786_p2 = scmp.lt.s32.totalorder %s154_s25, %s154_s25 }
  0x1e   : > { %p3779_p7 = scmp.ne.s32.totalorder %s154_s25, %s3778_s11  ;;  %p3787_p6 = scmp.lt.s32.totalorder %s3778_s11, %s3778_s11 }
  0x20   : > { %p3781_p9 = pnand %p3779_p7, %p3767_p12  ;;  %p3788_p4 = por %p3787_p6, %p3786_p2 }
  0x22   : > { %p3782_p1 = pneg %p3781_p9 }
  0x24   : > { %p3789_p8 = pnand %p3788_p4, %p3782_p1 }
  0x26   : > { %3792 = shalt.err (!%p3789_p8)
}
  0x27   : > { %s3896_s12 = smov 128   ;;  %s3897_s13 = smov 8  }
  0x28   : > { %3683 = dma.hbm_to_vmem [thread:$0]  (!%p3975_p10), %s4932_s1, 2048, %s154_s25, [#allocation6], %s3896_s12, %s3896_s12, %s3897_s13  }
  0x29   : > { %p26_p1 = scmp.eq.s32.totalorder %s25_s29, 0  ;;  %p35_p2 = scmp.ne.s32.totalorder %s3889_s17, %s3885_s16 }
  0x2a   : > { %p36_p4 = scmp.eq.s32.totalorder %s3893_s18, 0  ;;  %p3693_p6 = scmp.lt.s32.totalorder %s3893_s18, 8 }
  0x2b   : > { %s4009_s24 = scalar_select %p26_p1, %s3889_s17, %s28_s28  }
  0x2c   : > { %p37_p8 = por %p36_p4, %p35_p2  ;;  %p4987_p11 = scmp.eq.s32.totalorder %s3948_s19, 7 }
  0x2d   : > { %s173_s26 = sand.u32 1, %s3889_s17   ;;  %s2390_s5 = sshll.u32 %s3893_s18, 10 }
  0x2e   : > { %p4013_p12 = por %p4987_p11, %p35_p2  ;;  %s2376_s6 = sshll.u32 %s173_s26, 6 }
  0x2f   : > { %s4022_s9 = scalar_lea.hbm %s4931_s0, %s2390_s5  ;;  %s177_s25 = scalar_lea.vmem [#allocation2], %s2376_s6 }
  0x30   : > { %s184_s28 = sshll.u32 %s177_s25, 4  ;;  %p4024_p10 = pnand %p3693_p6, %p37_p8  ;;  %s4028_s28 = int_to_ptr.vmem [resolvable:$true] %s184_s28 }
  0x31   : > { %s4030_s10 = scalar_lea.sflag [#allocation3], %s173_s26  ;;  %s3793_s11 = scalar_lea.hbm %s4022_s9, 1024 }
  0x32   : > { %p3794_p13 = scmp.ne.s32.totalorder %s4022_s9, %s3793_s11  ;;  %p3795_p0 = pneg %p4024_p10 }
  0x33   : > { %s3798_s5 = scalar_lea.hbm %s4931_s0, 8192  ;;  %p3799_p7 = scmp.lt.u32.totalorder %s4022_s9, %s4931_s0 }
  0x34   : > { %p3796_p3 = pnand %p3795_p0, %p3794_p13  ;;  %p3800_p9 = scmp.lt.u32.totalorder %s3798_s5, %s3793_s11 }
  0x35   : > { %p3802_p2 = scmp.lt.u32.totalorder %s3793_s11, %s4022_s9 }
  0x36   : > { %p3797_p5 = pneg %p3796_p3  ;;  %p3801_p1 = por %p3800_p9, %p3799_p7 }
  0x38   : > { %p3803_p4 = por %p3802_p2, %p3801_p1 }
  0x3a   : > { %p3804_p6 = pnand %p3803_p4, %p3797_p5 }
  0x3c   : > { %3807 = shalt.err (!%p3804_p6)
}
  0x3d   : > { %s3808_s26 = scalar_lea.vmem %s4028_s28, 1024  ;;  %s3898_s8 = smov [#allocation2]  }
  0x3e   : > { %p3809_p8 = scmp.ne.s32.totalorder %s4028_s28, %s3808_s26  ;;  %s3813_s25 = sshll.u32 %s3898_s8, 4  ;;  %s3814_s25 = int_to_ptr.vmem [resolvable:$false] %s3813_s25 }
  0x3f   : > { %s3815_s14 = scalar_lea.vmem %s3814_s25, 2048  ;;  %p3816_p3 = scmp.lt.s32.totalorder %s4028_s28, %s3814_s25 }
  0x40   : > { %p3811_p11 = pnand %p3809_p8, %p3795_p0  ;;  %p3817_p7 = scmp.lt.s32.totalorder %s3815_s14, %s3808_s26 }
  0x42   : > { %p3812_p13 = pneg %p3811_p11  ;;  %p3818_p9 = por %p3817_p7, %p3816_p3 }
  0x44   : > { %p3819_p1 = pnand %p3818_p9, %p3812_p13 }
  0x46   : > { %3822 = shalt.err (!%p3819_p1)
}
  0x47   : > { %3687 = dma.hbm_to_vmem [thread:$0]  (!%p4024_p10), %s4022_s9, 1024, %s4028_s28, %s4030_s10, %s3896_s12, %s3896_s12, %s3897_s13  }
  0x48   : > { %p4990_p0 = scmp.ne.s32.totalorder %s4985_s23, 0 }
  0x4a   : > { %196 = sbr.rel (%p4990_p0) target bundleno = 947 (0x3b3), region = 36 }
  0x51   : > { %s4064_s11 = sand.u32 1, %s3885_s16   ;;  %p4991_p5 = scmp.ne.s32.totalorder %s4983_s21, 0 }
  0x52   : > { %s2380_s20 = sshll.u32 %s4064_s11, 6  ;;  %s199_s5 = scalar_lea.sflag [#allocation3], %s4064_s11 }
  0x53   : > { %s4070_s29 = scalar_lea.vmem [#allocation2], %s2380_s20 }
  0x54   : > { %3868 = dma.done.wait (%p4991_p5), %s199_s5, 1024  }
  0x55   : > { %3870 = vsyncadd (%p4991_p5), %s199_s5, 4294966272  ;;  %p4992_p10 = scmp.eq.s32.totalorder %s3948_s19, 0 }
  0x57   : > { %3872 = dma.done.wait (%p4992_p10), [#allocation6], 2048   ;;  %p4993_p2 = pmov %p4992_p10 }
  0x58   : > { %v241_v0 = vld [vmem:[#allocation5] sm:$0xff]  ;;  %v242_v1 = vld [vmem:[#allocation5 + $0x8] sm:$0xff]  ;;  %v243_v2 = vld [vmem:[#allocation5 + $0x10] sm:$0xff]  ;;  %s4867_s9 = scalar_lea.vmem [#allocation7], %s2380_s20  ;;  %s2391_s28 = sshll.u32 %s3948_s19, 10 }
  0x59   : > { %3874 = vsyncadd (%p4993_p2), [#allocation6], 4294965248  ;;  %v258_v3 = vand.u32 4294901760, %v241_v0  ;;  %v261_v4 = vand.u32 4294901760, %v242_v1  ;;  %v244_v5 = vld [vmem:[#allocation5 + $0x18] sm:$0xff]  ;;  %v264_v6 = vand.u32 4294901760, %v243_v2  ;;  %s4884_s26 = scalar_lea.hbm %s4935_s4, %s2391_s28 }
  0x5a   : > { %v245_v7 = vld [vmem:[#allocation5 + $0x20] sm:$0xff]  ;;  %v246_v8 = vld [vmem:[#allocation5 + $0x28] sm:$0xff]  ;;  %v267_v9 = vand.u32 4294901760, %v244_v5  ;;  %v4084_v14 = vld [vmem:[#allocation5 + $0x30] sm:$0xff]  ;;  %s2289_s10 = sshll.u32 %s4867_s9, 4  ;;  %s2276_s19 = scalar_lea.sflag [#allocation4], %s4064_s11  ;;  %s4886_s10 = int_to_ptr.vmem [resolvable:$true] %s2289_s10 }
  0x5b   : > { %v4080_v10 = vpack.c.bf16 %v261_v4, %v258_v3  ;;  %v270_v11 = vand.u32 4294901760, %v245_v7  ;;  %v273_v12 = vand.u32 4294901760, %v246_v8  ;;  %v4086_v15 = vld [vmem:[#allocation5 + $0x38] sm:$0xff]  ;;  %v4090_v16 = vld [vmem:[%s4070_s29] sm:$0xff]  ;;  %v276_v19 = vand.u32 4294901760, %v4084_v14  ;;  %v4105_v22 = vld [vmem:[#allocation5 + $0x48] sm:$0xff] }
  0x5c   : > { %v4082_v13 = vpack.c.bf16 %v267_v9, %v264_v6  ;;  %4994 = vst [vmem:[#allocation11_spill] sm:$0xff] %v4090_v16  ;;  %v4095_v17 = vand.u32 4294901760, %v4090_v16  ;;  %v279_v20 = vand.u32 4294901760, %v4086_v15  ;;  %v4103_v21 = vld [vmem:[#allocation5 + $0x40] sm:$0xff]  ;;  %v4114_v25 = vld [vmem:[#allocation5 + $0x50] sm:$0xff]  ;;  %v4117_v27 = vsub.f32 %v241_v0, %v258_v3  ;;  %v4131_v31 = vld [vmem:[%s4070_s29 + $0x8] sm:$0xff] }
  0x5d   : > { %3209 = vmatprep.subr.bf16.mxu0 %v4080_v10  ;;  %3401 = vmatprep.subr.bf16.mxu1 %v4080_v10  ;;  %v4099_v18 = vpack.c.bf16 %v273_v12, %v270_v11  ;;  %v282_v24 = vand.u32 4294901760, %v4103_v21  ;;  %v4119_v28 = vsub.f32 %v242_v1, %v261_v4  ;;  %v285_v30 = vand.u32 4294901760, %v4105_v22  ;;  %4996 = vst [vmem:[#allocation13_spill] sm:$0xff] %v4131_v31  ;;  %v4138_v34 = vld [vmem:[#allocation5 + $0x58] sm:$0xff]  ;;  %v4149_v39 = vld [vmem:[#allocation5 + $0x60] sm:$0xff]  ;;  %v4151_v40 = vld [vmem:[#allocation5 + $0x68] sm:$0xff] }
  0x5e   : > { %3211 = vmatpush3.bf16.msra.mxu0 %v4080_v10  ;;  %3403 = vmatpush3.bf16.msra.mxu1 %v4080_v10  ;;  %v4109_v23 = vsub.f32 %v4090_v16, %v4095_v17  ;;  %v4127_v29 = vpack.c.bf16 %v279_v20, %v276_v19  ;;  %v4133_v32 = vsub.f32 %v243_v2, %v264_v6  ;;  %v288_v38 = vand.u32 4294901760, %v4114_v25  ;;  %v4170_v49 = vld [vmem:[%s4070_s29 + $0x10] sm:$0xff]  ;;  %v4178_v54 = vld [vmem:[%s4070_s29 + $0x18] sm:$0xff]  ;;  %v4223_v3 = vld [vmem:[%s4070_s29 + $0x20] sm:$0xff]  ;;  %s3823_s8 = scalar_lea.vmem %s4886_s10, 1024  ;;  %s3899_s25 = smov [#allocation7]  }
  0x5f   : > { %3213 = vmatprep.subr.bf16.mxu0 %v4082_v13  ;;  %3405 = vmatprep.subr.bf16.mxu1 %v4082_v13  ;;  %v4135_v33 = vsub.f32 %v244_v5, %v267_v9  ;;  %v4143_v36 = vsub.f32 %v245_v7, %v270_v11  ;;  %v4145_v37 = vsub.f32 %v246_v8, %v273_v12  ;;  %v4946_v42 = vand.u32 4294901760, %v4117_v27  ;;  %v4181_v55 = vld [vmem:[#allocation5 + $0x70] sm:$0xff]  ;;  %v4183_v56 = vld [vmem:[#allocation5 + $0x78] sm:$0xff]  ;;  %p3824_p4 = scmp.ne.s32.totalorder %s4886_s10, %s3823_s8  ;;  %s3827_s14 = sshll.u32 %s3899_s25, 4  ;;  %s3828_s14 = int_to_ptr.vmem [resolvable:$false] %s3827_s14 }
  0x60   : > { %v4939_v26 = vand.u32 4294901760, %v4109_v23  ;;  %4995 = vst [vmem:[#allocation12_spill] sm:$0xff] %v4127_v29  ;;  %v4945_v43 = vand.u32 4294901760, %v4119_v28  ;;  %v4156_v44 = vand.u32 4294901760, %v4131_v31  ;;  %v4164_v45 = vpack.c.bf16 %v285_v30, %v282_v24  ;;  %4998 = vst [vmem:[#allocation15_spill] sm:$0xff] %v4170_v49  ;;  %s3829_s20 = scalar_lea.vmem %s3828_s14, 2048  ;;  %p3830_p11 = scmp.lt.s32.totalorder %s4886_s10, %s3828_s14 }
  0x61   : > { %v291_v46 = vand.u32 4294901760, %v4138_v34  ;;  %v4943_v47 = vand.u32 4294901760, %v4133_v32  ;;  %v4942_v48 = vand.u32 4294901760, %v4135_v33  ;;  %v4941_v50 = vand.u32 4294901760, %v4143_v36  ;;  %4999 = vst [vmem:[#allocation16_spill] sm:$0xff] %v4178_v54  ;;  %5001 = vst [vmem:[#allocation18_spill] sm:$0xff] %v4223_v3  ;;  %p3825_p6 = pnand %p3824_p4, %p4013_p12  ;;  %p3831_p13 = scmp.lt.s32.totalorder %s3829_s20, %s3823_s8 }
  0x62   : > { %3215 = vmatpush3.bf16.msra.mxu0 %v4082_v13  ;;  %3407 = vmatpush3.bf16.msra.mxu1 %v4082_v13  ;;  %v341_v35 = vsub.f32 %v4109_v23, %v4939_v26  ;;  %4997 = vst [vmem:[#allocation14_spill] sm:$0xff] %v4164_v45  ;;  %v4940_v51 = vand.u32 4294901760, %v4145_v37  ;;  %v4949_v52 = vand.u32 4294901760, %v4149_v39  ;;  %v4947_v53 = vand.u32 4294901760, %v4151_v40 }
  0x63   : > { %3217 = vmatprep.subr.bf16.mxu0 %v4099_v18  ;;  %3409 = vmatprep.subr.bf16.mxu1 %v4099_v18  ;;  %v422_v57 = vsub.f32 %v4117_v27, %v4946_v42  ;;  %v429_v58 = vsub.f32 %v4119_v28, %v4945_v43  ;;  %v4193_v59 = vsub.f32 %v4131_v31, %v4156_v44  ;;  %v4196_v60 = vand.u32 4294901760, %v4170_v49  ;;  %v4296_v43 = vld [vmem:[%s4070_s29 + $0x38] sm:$0xff]  ;;  %p3826_p8 = pneg %p3825_p6  ;;  %p3832_p3 = por %p3831_p13, %p3830_p11 }
  0x64   : > { %v342_v41 = vand.u32 4294901760, %v341_v35  ;;  %v4204_v61 = vpack.c.bf16 %v291_v46, %v288_v38  ;;  %v436_v62 = vsub.f32 %v4133_v32, %v4943_v47  ;;  %v443_v63 = vsub.f32 %v4135_v33, %v4942_v48  ;;  %5007 = vst [vmem:[#allocation24_spill] sm:$0xff] %v4296_v43 }
  0x65   : > { %v450_v0 = vsub.f32 %v4143_v36, %v4941_v50  ;;  %v457_v1 = vsub.f32 %v4145_v37, %v4940_v51  ;;  %v4220_v2 = vand.u32 4294901760, %v4178_v54  ;;  %v4229_v4 = vpack.c.bf16 %v4947_v53, %v4949_v52  ;;  %p3833_p7 = pnand %p3832_p3, %p3826_p8 }
  0x66   : > { %3219 = vmatpush3.bf16.msra.mxu0 %v4099_v18  ;;  %3411 = vmatpush3.bf16.msra.mxu1 %v4099_v18  ;;  %5000 = vst [vmem:[#allocation17_spill] sm:$0xff] %v4204_v61  ;;  %v300_v5 = vand.u32 4294901760, %v4181_v55  ;;  %v303_v6 = vand.u32 4294901760, %v4183_v56  ;;  %v4236_v7 = vsub.f32 %v4084_v14, %v276_v19  ;;  %v423_v8 = vand.u32 4294901760, %v422_v57  ;;  %v4254_v57 = vld [vmem:[%s4070_s29 + $0x28] sm:$0xff] }
  0x67   : > { %3221 = vmatprep.subr.bf16.mxu0 %v4127_v29  ;;  %3413 = vmatprep.subr.bf16.mxu1 %v4127_v29  ;;  %5002 = vst [vmem:[#allocation19_spill] sm:$0xff] %v4229_v4  ;;  %v430_v9 = vand.u32 4294901760, %v429_v58  ;;  %v4944_v11 = vand.u32 4294901760, %v4193_v59  ;;  %v4242_v12 = vsub.f32 %v4170_v49, %v4196_v60  ;;  %v437_v35 = vand.u32 4294901760, %v436_v62  ;;  %5003 = vst [vmem:[#allocation20_spill] sm:$0xff] %v4254_v57  ;;  %v4263_v62 = vld [vmem:[%s4070_s29 + $0x30] sm:$0xff] }
  0x68   : > { %2712 = vmatprep.mubr.f32.mxu0 %v342_v41  ;;  %v444_v41 = vand.u32 4294901760, %v443_v63  ;;  %v4248_v14 = vsub.f32 %v4178_v54, %v4220_v2  ;;  %v4251_v19 = vand.u32 4294901760, %v4223_v3  ;;  %v451_v58 = vand.u32 4294901760, %v450_v0  ;;  %5004 = vst [vmem:[#allocation21_spill] sm:$0xff] %v4263_v62 }
  0x69   : > { %v458_v26 = vand.u32 4294901760, %v457_v1  ;;  %v4260_v51 = vsub.f32 %v4086_v15, %v279_v20  ;;  %v4265_v63 = vpack.c.bf16 %v303_v6, %v300_v5  ;;  %v4948_v50 = vand.u32 4294901760, %v4236_v7 }
  0x6a   : > { %3223 = vmatpush3.bf16.msra.mxu0 %v4127_v29  ;;  %3415 = vmatpush3.bf16.msra.mxu1 %v4127_v29  ;;  %v4271_v48 = vsub.f32 %v4103_v21, %v282_v24  ;;  %v351_v0 = vsub.f32 %v4193_v59, %v4944_v11  ;;  %v4950_v15 = vand.u32 4294901760, %v4242_v12  ;;  %v4280_v20 = vsub.f32 %v4223_v3, %v4251_v19 }
  0x6b   : > { %3225 = vmatprep.subr.bf16.mxu0 %v4164_v45  ;;  %3417 = vmatprep.subr.bf16.mxu1 %v4164_v45  ;;  %5005 = vst [vmem:[#allocation22_spill] sm:$0xff] %v4265_v63  ;;  %v4283_v1 = vand.u32 4294901760, %v4254_v57  ;;  %v4287_v21 = vpack.c.bf16 %v430_v9, %v423_v8  ;;  %v4289_v24 = vpack.c.bf16 %v444_v41, %v437_v35  ;;  %v4953_v47 = vand.u32 4294901760, %v4248_v14 }
  0x6c   : > { %v4293_v11 = vand.u32 4294901760, %v4263_v62  ;;  %v4299_v42 = vpack.c.bf16 %v458_v26, %v451_v58  ;;  %v470_v53 = vand.u32 4294901760, %v4260_v51  ;;  %v4305_v8 = vsub.f32 %v4105_v22, %v285_v30 }
  0x6d   : > { %5006 = vst [vmem:[#allocation23_spill] sm:$0xff] %v4287_v21  ;;  %v4309_v9 = vsub.f32 %v4254_v57, %v4283_v1  ;;  %v4314_v35 = vsub.f32 %v4236_v7, %v4948_v50  ;;  %v477_v41 = vand.u32 4294901760, %v4271_v48  ;;  %v4320_v26 = vsub.f32 %v4114_v25, %v288_v38 }
  0x6e   : > { %3227 = vmatpush3.bf16.msra.mxu0 %v4164_v45  ;;  %3419 = vmatpush3.bf16.msra.mxu1 %v4164_v45  ;;  %v4324_v22 = vsub.f32 %v4263_v62, %v4293_v11  ;;  %v361_v30 = vsub.f32 %v4242_v12, %v4950_v15  ;;  %v4333_v58 = vsub.f32 %v4138_v34, %v291_v46  ;;  %v4337_v25 = vand.u32 4294901760, %v4296_v43 }
  0x6f   : > { %3229 = vmatprep.subr.bf16.mxu0 %v4204_v61  ;;  %3421 = vmatprep.subr.bf16.mxu1 %v4204_v61  ;;  %5008 = vst [vmem:[#allocation25_spill] sm:$0xff] %v4309_v9  ;;  %v352_v38 = vand.u32 4294901760, %v351_v0  ;;  %v371_v52 = vsub.f32 %v4248_v14, %v4953_v47  ;;  %v5010_v15 = vand.u32 4294901760, %v4149_v39  ;;  %v5011_v34 = vand.u32 4294901760, %v4151_v40 }
  0x70   : > { %5009 = vst [vmem:[#allocation26_spill] sm:$0xff] %v4324_v22  ;;  %v4358_v3 = vsub.f32 %v4181_v55, %v300_v5  ;;  %v4361_v47 = vsub.f32 %v4183_v56, %v303_v6  ;;  %v484_v57 = vand.u32 4294901760, %v4305_v8  ;;  %v362_v0 = vand.u32 4294901760, %v361_v30 }
  0x71   : > { %v4347_v62 = vsub.f32 %v4149_v39, %v5010_v15  ;;  %v4352_v46 = vsub.f32 %v4151_v40, %v5011_v34  ;;  %v471_v39 = vsub.f32 %v4260_v51, %v470_v53  ;;  %v478_v15 = vsub.f32 %v4271_v48, %v477_v41 }
  0x72   : > { %3231 = vmatpush3.bf16.msra.mxu0 %v4204_v61  ;;  %3423 = vmatpush3.bf16.msra.mxu1 %v4204_v61  ;;  %v4368_v40 = vsub.f32 %v4296_v43, %v4337_v25  ;;  %v465_v34 = vand.u32 4294901760, %v4314_v35  ;;  %v491_v55 = vand.u32 4294901760, %v4320_v26  ;;  %v5012_v56 = vand.u32 4294901760, %v4280_v20 }
  0x73   : > { %3233 = vmatprep.subr.bf16.mxu0 %v4229_v4  ;;  %3425 = vmatprep.subr.bf16.mxu1 %v4229_v4  ;;  %v498_v6 = vand.u32 4294901760, %v4333_v58  ;;  %v372_v50 = vand.u32 4294901760, %v371_v52  ;;  %v505_v43 = vand.u32 4294901760, %v4347_v62  ;;  %v512_v49 = vand.u32 4294901760, %v4352_v46 }
  0x74   : > { %v381_v5 = vsub.f32 %v4280_v20, %v5012_v56  ;;  %v5013_v35 = vand.u32 4294901760, %v4309_v9  ;;  %v5014_v54 = vand.u32 4294901760, %v4324_v22  ;;  %v519_v16 = vand.u32 4294901760, %v4358_v3 }
  0x75   : > { %v526_v31 = vand.u32 4294901760, %v4361_v47  ;;  %v5018_v45 = vand.u32 4294901760, %v4133_v32  ;;  %v5023_v52 = vand.u32 4294901760, %v4236_v7 }
  0x76   : > { %3235 = vmatpush3.bf16.msra.mxu0 %v4229_v4  ;;  %3427 = vmatpush3.bf16.msra.mxu1 %v4229_v4  ;;  %v391_v30 = vsub.f32 %v4309_v9, %v5013_v35  ;;  %v401_v56 = vsub.f32 %v4324_v22, %v5014_v54  ;;  %v5016_v4 = vand.u32 4294901760, %v4119_v28  ;;  %v5019_v35 = vand.u32 4294901760, %v4135_v33 }
  0x77   : > { %3237 = vmatprep.subr.bf16.mxu0 %v4265_v63  ;;  %3429 = vmatprep.subr.bf16.mxu1 %v4265_v63  ;;  %v5021_v54 = vand.u32 4294901760, %v4143_v36  ;;  %v5022_v22 = vand.u32 4294901760, %v4145_v37 }
  0x78   : > { %v4401_v29 = vpack.c.bf16 %v5019_v35, %v5018_v45  ;;  %v472_v45 = vand.u32 4294901760, %v471_v39  ;;  %v485_v35 = vsub.f32 %v4305_v8, %v484_v57  ;;  %v402_v39 = vand.u32 4294901760, %v401_v56 }
  0x79   : > { %v4407_v9 = vpack.c.bf16 %v5022_v22, %v5021_v54  ;;  %v4422_v22 = vpack.c.bf16 %v526_v31, %v519_v16  ;;  %v479_v54 = vand.u32 4294901760, %v478_v15  ;;  %v513_v56 = vsub.f32 %v4352_v46, %v512_v49 }
  0x7a   : > { %3239 = vmatpush3.bf16.msra.mxu0 %v4265_v63  ;;  %3431 = vmatpush3.bf16.msra.mxu1 %v4265_v63  ;;  %v5015_v63 = vand.u32 4294901760, %v4117_v27  ;;  %5020 = vst [vmem:[#allocation28_spill] sm:$0xff] %v4401_v29  ;;  %v4420_v29 = vpack.c.bf16 %v512_v49, %v505_v43 }
  0x7b   : > { %3241 = vmatprep.subr.bf16.mxu0 %v4287_v21  ;;  %3433 = vmatprep.subr.bf16.mxu1 %v4287_v21 }
  0x7c   : > { %v4395_v61 = vpack.c.bf16 %v5016_v4, %v5015_v63  ;;  %v4412_v4 = vpack.c.bf16 %v470_v53, %v5023_v52  ;;  %v4414_v63 = vpack.c.bf16 %v484_v57, %v477_v41  ;;  %v492_v41 = vsub.f32 %v4320_v26, %v491_v55 }
  0x7d   : > { %2713 = vmatmul.mubr.f32.vlgmr.msra.gmra.mrb[0].mxu0 %v352_v38  ;;  %v382_v38 = vand.u32 4294901760, %v381_v5  ;;  %v5024_v5 = vand.u32 4294901760, %v4368_v40  ;;  %v499_v52 = vsub.f32 %v4333_v58, %v498_v6  ;;  %v4431_v57 = vpack.c.bf16 %v472_v45, %v465_v34 }
  0x7e   : > { %5017 = vst [vmem:[#allocation27_spill] sm:$0xff] %v4395_v61  ;;  %3243 = vmatpush3.bf16.msra.mxu0 %v4287_v21  ;;  %2715 = vmatprep.mubr.f32.mxu0 %v362_v0  ;;  %v4416_v61 = vpack.c.bf16 %v498_v6, %v491_v55  ;;  %v392_v0 = vand.u32 4294901760, %v391_v30  ;;  %v486_v21 = vand.u32 4294901760, %v485_v35  ;;  %v493_v30 = vand.u32 4294901760, %v492_v41 }
  0x7f   : > { %3245 = vmatprep.subr.bf16.mxu0 %v4289_v24  ;;  %v411_v53 = vsub.f32 %v4368_v40, %v5024_v5  ;;  %v500_v5 = vand.u32 4294901760, %v499_v52  ;;  %v506_v6 = vsub.f32 %v4347_v62, %v505_v43  ;;  %v520_v45 = vsub.f32 %v4358_v3, %v519_v16 }
  0x80   : > { %v4435_v55 = vpack.c.bf16 %v486_v21, %v479_v54  ;;  %v527_v21 = vsub.f32 %v4361_v47, %v526_v31  ;;  %v4458_v16 = vpack.c.bf16 %v4119_v28, %v4117_v27  ;;  %v4464_v31 = vpack.c.bf16 %v4135_v33, %v4133_v32  ;;  %v5043_v54 = vld [vmem:[#allocation11_spill] sm:$0xff] }
  0x81   : > { %2716 = vmatmul.mubr.f32.gmra.mrb[2].mxu0 %v372_v50  ;;  %v412_v50 = vand.u32 4294901760, %v411_v53  ;;  %v4440_v15 = vpack.c.bf16 %v500_v5, %v493_v30  ;;  %v507_v34 = vand.u32 4294901760, %v506_v6  ;;  %v521_v49 = vand.u32 4294901760, %v520_v45  ;;  %v5036_v53 = vld [vmem:[#allocation28_spill] sm:$0xff]  ;;  %v5045_v5 = vld [vmem:[#allocation15_spill] sm:$0xff] }
  0x82   : > { %3247 = vmatpush3.bf16.msra.mxu0 %v4289_v24  ;;  %2718 = vmatprep.mubr.f32.mxu0 %v382_v38  ;;  %v514_v38 = vand.u32 4294901760, %v513_v56  ;;  %v528_v35 = vand.u32 4294901760, %v527_v21  ;;  %v4472_v27 = vpack.c.bf16 %v4145_v37, %v4143_v36  ;;  %v4480_v28 = vpack.c.bf16 %v4260_v51, %v4236_v7  ;;  %v5027_v51 = vld [vmem:[#allocation12_spill] sm:$0xff]  ;;  %v5029_v7 = vld [vmem:[#allocation14_spill] sm:$0xff] }
  0x83   : > { %3249 = vmatprep.subr.bf16.mxu0 %v4299_v42  ;;  %v4488_v32 = vpack.c.bf16 %v4305_v8, %v4271_v48  ;;  %v4496_v33 = vpack.c.bf16 %v4333_v58, %v4320_v26  ;;  %v4502_v36 = vpack.c.bf16 %v4352_v46, %v4347_v62  ;;  %v4508_v37 = vpack.c.bf16 %v4361_v47, %v4358_v3  ;;  %v5025_v47 = vld [vmem:[#allocation25_spill] sm:$0xff]  ;;  %v5026_v48 = vld [vmem:[#allocation26_spill] sm:$0xff]  ;;  %v5031_v8 = vld [vmem:[#allocation19_spill] sm:$0xff] }
  0x84   : > { %v4448_v43 = vpack.c.bf16 %v514_v38, %v507_v34  ;;  %v5028_v3 = vand.u32 4294901760, %v4109_v23  ;;  %v5030_v62 = vld [vmem:[#allocation17_spill] sm:$0xff]  ;;  %v5032_v26 = vld [vmem:[#allocation22_spill] sm:$0xff]  ;;  %v5035_v46 = vand.u32 4294901760, %v4242_v12  ;;  %v5037_v41 = vand.u32 4294901760, %v4248_v14 }
  0x85   : > { %2719 = vmatmul.mubr.f32.gmra.mrb[4].mxu0 %v392_v0  ;;  %v4452_v0 = vpack.c.bf16 %v528_v35, %v521_v49  ;;  %v5033_v58 = vld [vmem:[#allocation27_spill] sm:$0xff]  ;;  %v5038_v52 = vand.u32 4294901760, %v4280_v20  ;;  %v5046_v35 = vld [vmem:[#allocation20_spill] sm:$0xff] }
  0x86   : > { %3251 = vmatpush3.bf16.msra.mxu0 %v4299_v42  ;;  %2721 = vmatprep.mubr.f32.mxu0 %v402_v39 }
  0x87   : > { %3253 = vmatprep.subr.bf16.mxu0 %v4431_v57 }
  0x89   : > { %2722 = vmatmul.mubr.f32.gmra.mrb[6].mxu0 %v412_v50 }
  0x8a   : > { %3255 = vmatpush3.bf16.msra.mxu0 %v4431_v57  ;;  %2756 = vmatprep.mubr.f32.mxu0 %v4095_v17 }
  0x8b   : > { %3257 = vmatprep.subr.bf16.mxu0 %v4435_v55 }
  0x8e   : > { %3259 = vmatpush3.bf16.msra.mxu0 %v4435_v55 }
  0x8f   : > { %3261 = vmatprep.subr.bf16.mxu0 %v4440_v15 }
  0x92   : > { %3263 = vmatpush3.bf16.msra.mxu0 %v4440_v15 }
  0x93   : > { %3265 = vmatprep.subr.bf16.mxu0 %v4448_v43 }
  0x96   : > { %3267 = vmatpush3.bf16.msra.mxu0 %v4448_v43 }
  0x97   : > { %3269 = vmatprep.subr.bf16.mxu0 %v4452_v0 }
  0x9a   : > { %3271 = vmatpush3.bf16.msra.mxu0 %v4452_v0 }
  0x9b   : > { %3273 = vmatprep.subr.bf16.mxu0 %v4458_v16 }
  0x9d   : > { %2757 = vmatmul.mubr.f32.vlgmr.msra.gmra.mrb[0].mxu0 %v4156_v44 }
  0x9e   : > { %3275 = vmatpush3.bf16.msra.mxu0 %v4458_v16  ;;  %2759 = vmatprep.mubr.f32.mxu0 %v4196_v60 }
  0x9f   : > { %3277 = vmatprep.subr.bf16.mxu0 %v4464_v31 }
  0xa1   : > { %2760 = vmatmul.mubr.f32.gmra.mrb[2].mxu0 %v4220_v2 }
  0xa2   : > { %3279 = vmatpush3.bf16.msra.mxu0 %v4464_v31  ;;  %2762 = vmatprep.mubr.f32.mxu0 %v4251_v19 }
  0xa3   : > { %3281 = vmatprep.subr.bf16.mxu0 %v4472_v27 }
  0xa5   : > { %2763 = vmatmul.mubr.f32.gmra.mrb[4].mxu0 %v4283_v1 }
  0xa6   : > { %3283 = vmatpush3.bf16.msra.mxu0 %v4472_v27  ;;  %2765 = vmatprep.mubr.f32.mxu0 %v4293_v11 }
  0xa7   : > { %3285 = vmatprep.subr.bf16.mxu0 %v4480_v28 }
  0xa9   : > { %2766 = vmatmul.mubr.f32.gmra.mrb[6].mxu0 %v4337_v25 }
  0xaa   : > { %3287 = vmatpush3.bf16.msra.mxu0 %v4480_v28  ;;  %2800 = vmatprep.mubr.f32.mxu0 %v4109_v23  ;;  %v5034_v23 = vand.u32 4294901760, %v4193_v59 }
  0xab   : > { %3289 = vmatprep.subr.bf16.mxu0 %v4488_v32 }
  0xae   : > { %3291 = vmatpush3.bf16.msra.mxu0 %v4488_v32 }
  0xaf   : > { %3293 = vmatprep.subr.bf16.mxu0 %v4496_v33 }
  0xb2   : > { %3295 = vmatpush3.bf16.msra.mxu0 %v4496_v33 }
  0xb3   : > { %3297 = vmatprep.subr.bf16.mxu0 %v4502_v36 }
  0xb6   : > { %3299 = vmatpush3.bf16.msra.mxu0 %v4502_v36 }
  0xb7   : > { %3301 = vmatprep.subr.bf16.mxu0 %v4508_v37 }
  0xba   : > { %3303 = vmatpush3.bf16.msra.mxu0 %v4508_v37 }
  0xbb   : > { %3305 = vmatprep.subr.bf16.mxu0 %v4080_v10 }
  0xbd   : > { %2801 = vmatmul.mubr.f32.vlgmr.msra.gmra.mrb[0].mxu0 %v4193_v59  ;;  %v5039_v59 = vand.u32 4294901760, %v5025_v47 }
  0xbe   : > { %3307 = vmatpush3.bf16.msra.mxu0 %v4080_v10  ;;  %2803 = vmatprep.mubr.f32.mxu0 %v4242_v12  ;;  %v5040_v12 = vand.u32 4294901760, %v5026_v48 }
  0xbf   : > { %3309 = vmatprep.subr.bf16.mxu0 %v4082_v13 }
  0xc1   : > { %2804 = vmatmul.mubr.f32.gmra.mrb[2].mxu0 %v4248_v14  ;;  %v5041_v14 = vand.u32 4294901760, %v4368_v40 }
  0xc2   : > { %3311 = vmatpush3.bf16.msra.mxu0 %v4082_v13  ;;  %2806 = vmatprep.mubr.f32.mxu0 %v4280_v20  ;;  %v5042_v20 = vld [vmem:[#allocation13_spill] sm:$0xff] }
  0xc3   : > { %3313 = vmatprep.subr.bf16.mxu0 %v4099_v18 }
  0xc5   : > { %2807 = vmatmul.mubr.f32.gmra.mrb[4].mxu0 %v5025_v47 }
  0xc6   : > { %3315 = vmatpush3.bf16.msra.mxu0 %v4099_v18  ;;  %2809 = vmatprep.mubr.f32.mxu0 %v5026_v48 }
  0xc7   : > { %3317 = vmatprep.subr.bf16.mxu0 %v5027_v51 }
  0xc9   : > { %2810 = vmatmul.mubr.f32.gmra.mrb[6].mxu0 %v4368_v40 }
  0xca   : > { %3319 = vmatpush3.bf16.msra.mxu0 %v5027_v51  ;;  %2844 = vmatprep.mubr.f32.mxu0 %v5028_v3 }
  0xcb   : > { %3321 = vmatprep.subr.bf16.mxu0 %v5029_v7 }
  0xce   : > { %3323 = vmatpush3.bf16.msra.mxu0 %v5029_v7 }
  0xcf   : > { %3325 = vmatprep.subr.bf16.mxu0 %v5030_v62 }
  0xd2   : > { %3327 = vmatpush3.bf16.msra.mxu0 %v5030_v62 }
  0xd3   : > { %3329 = vmatprep.subr.bf16.mxu0 %v5031_v8 }
  0xd6   : > { %3331 = vmatpush3.bf16.msra.mxu0 %v5031_v8 }
  0xd7   : > { %3333 = vmatprep.subr.bf16.mxu0 %v5032_v26 }
  0xda   : > { %3335 = vmatpush3.bf16.msra.mxu0 %v5032_v26 }
  0xdb   : > { %3337 = vmatprep.subr.bf16.mxu0 %v5033_v58 }
  0xdd   : > { %2845 = vmatmul.mubr.f32.vlgmr.msra.gmra.mrb[0].mxu0 %v5034_v23 }
  0xde   : > { %3339 = vmatpush3.bf16.msra.mxu0 %v5033_v58  ;;  %2847 = vmatprep.mubr.f32.mxu0 %v5035_v46  ;;  %v5047_v46 = vld [vmem:[#allocation18_spill] sm:$0xff] }
  0xdf   : > { %3341 = vmatprep.subr.bf16.mxu0 %v5036_v53 }
  0xe1   : > { %2848 = vmatmul.mubr.f32.gmra.mrb[2].mxu0 %v5037_v41 }
  0xe2   : > { %3343 = vmatpush3.bf16.msra.mxu0 %v5036_v53  ;;  %2850 = vmatprep.mubr.f32.mxu0 %v5038_v52 }
  0xe3   : > { %3345 = vmatprep.subr.bf16.mxu0 %v4407_v9 }
  0xe5   : > { %2851 = vmatmul.mubr.f32.gmra.mrb[4].mxu0 %v5039_v59 }
  0xe6   : > { %3347 = vmatpush3.bf16.msra.mxu0 %v4407_v9  ;;  %2853 = vmatprep.mubr.f32.mxu0 %v5040_v12 }
  0xe7   : > { %3349 = vmatprep.subr.bf16.mxu0 %v4412_v4 }
  0xe9   : > { %2854 = vmatmul.mubr.f32.gmra.mrb[6].mxu0 %v5041_v14 }
  0xea   : > { %3351 = vmatpush3.bf16.msra.mxu0 %v4412_v4  ;;  %2888 = vmatprep.mubr.f32.mxu0 %v4095_v17 }
  0xeb   : > { %3353 = vmatprep.subr.bf16.mxu0 %v4414_v63 }
  0xee   : > { %3355 = vmatpush3.bf16.msra.mxu0 %v4414_v63 }
  0xef   : > { %3357 = vmatprep.subr.bf16.mxu0 %v4416_v61 }
  0xf2   : > { %3359 = vmatpush3.bf16.msra.mxu0 %v4416_v61 }
  0xf3   : > { %3361 = vmatprep.subr.bf16.mxu0 %v4420_v29 }
  0xf6   : > { %3363 = vmatpush3.bf16.msra.mxu0 %v4420_v29 }
  0xf7   : > { %3365 = vmatprep.subr.bf16.mxu0 %v4422_v22 }
  0xfa   : > { %3367 = vmatpush3.bf16.msra.mxu0 %v4422_v22 }
  0xfb   : > { %3369 = vmatprep.subr.bf16.mxu0 %v4080_v10 }
  0xfd   : > { %2889 = vmatmul.mubr.f32.vlgmr.msra.gmra.mrb[0].mxu0 %v4156_v44 }
  0xfe   : > { %3371 = vmatpush3.bf16.msra.mxu0 %v4080_v10  ;;  %2891 = vmatprep.mubr.f32.mxu0 %v4196_v60 }
  0xff   : > { %3373 = vmatprep.subr.bf16.mxu0 %v4082_v13 }
 0x101   : > { %2892 = vmatmul.mubr.f32.gmra.mrb[2].mxu0 %v4220_v2 }
 0x102   : > { %3375 = vmatpush3.bf16.msra.mxu0 %v4082_v13  ;;  %2894 = vmatprep.mubr.f32.mxu0 %v4251_v19 }
 0x103   : > { %3377 = vmatprep.subr.bf16.mxu0 %v4099_v18 }
 0x105   : > { %2895 = vmatmul.mubr.f32.gmra.mrb[4].mxu0 %v4283_v1 }
 0x106   : > { %3379 = vmatpush3.bf16.msra.mxu0 %v4099_v18  ;;  %2897 = vmatprep.mubr.f32.mxu0 %v4293_v11 }
 0x107   : > { %3381 = vmatprep.subr.bf16.mxu0 %v5027_v51 }
 0x109   : > { %2898 = vmatmul.mubr.f32.gmra.mrb[6].mxu0 %v4337_v25 }
 0x10a   : > { %3383 = vmatpush3.bf16.msra.mxu0 %v5027_v51  ;;  %2932 = vmatprep.mubr.f32.mxu0 %v4095_v17 }
 0x10b   : > { %3385 = vmatprep.subr.bf16.mxu0 %v5029_v7 }
 0x10e   : > { %3387 = vmatpush3.bf16.msra.mxu0 %v5029_v7 }
 0x10f   : > { %3389 = vmatprep.subr.bf16.mxu0 %v5030_v62 }
 0x112   : > { %3391 = vmatpush3.bf16.msra.mxu0 %v5030_v62 }
 0x113   : > { %3393 = vmatprep.subr.bf16.mxu0 %v5031_v8 }
 0x116   : > { %3395 = vmatpush3.bf16.msra.mxu0 %v5031_v8 }
 0x117   : > { %3397 = vmatprep.subr.bf16.mxu0 %v5032_v26 }
 0x11a   : > { %3399 = vmatpush3.bf16.msra.mxu0 %v5032_v26 }
 0x11d   : > { %2933 = vmatmul.mubr.f32.vlgmr.msra.gmra.mrb[0].mxu0 %v4156_v44 }
 0x11e   : > { %2935 = vmatprep.mubr.f32.mxu0 %v4196_v60 }
 0x121   : > { %2936 = vmatmul.mubr.f32.gmra.mrb[2].mxu0 %v4220_v2 }
 0x122   : > { %2938 = vmatprep.mubr.f32.mxu0 %v4251_v19 }
 0x125   : > { %2939 = vmatmul.mubr.f32.gmra.mrb[4].mxu0 %v4283_v1 }
 0x126   : > { %2941 = vmatprep.mubr.f32.mxu0 %v4293_v11  ;;  %v5044_v11 = vld [vmem:[#allocation16_spill] sm:$0xff] }
 0x129   : > { %2942 = vmatmul.mubr.f32.gmra.mrb[6].mxu0 %v4337_v25 }
 0x1f0   : > { %v2934_v17 = vpop.f32.mrb[0].mxu0 }
 0x1f1   : > { %v4601_v40 = vsub.f32 %v5042_v20, %v2934_v17  ;;  %v1153_v39 = vpop.f32.mrb[1].mxu0 }
 0x1f2   : > { %v4604_v50 = vsub.f32 %v5043_v54, %v1153_v39 }
 0x1f3   : > { %v1208_v44 = vmul.f32 %v4601_v40, %v4601_v40 }
 0x1f4   : > { %v1207_v60 = vmul.f32 %v4604_v50, %v4604_v50  ;;  %v2937_v2 = vpop.f32.mrb[2].mxu0 }
 0x1f5   : > { %v4610_v19 = vand.u32 4294901760, %v1208_v44  ;;  %v4613_v1 = vsub.f32 %v5044_v11, %v2937_v2  ;;  %v1165_v25 = vpop.f32.mrb[3].mxu0 }
 0x1f6   : > { %v4615_v30 = vand.u32 4294901760, %v1207_v60  ;;  %v4618_v6 = vsub.f32 %v5045_v5, %v1165_v25 }
 0x1f7   : > { %v4621_v56 = vsub.f32 %v1208_v44, %v4610_v19  ;;  %v1210_v34 = vmul.f32 %v4613_v1, %v4613_v1 }
 0x1f8   : > { %v4626_v38 = vsub.f32 %v1207_v60, %v4615_v30  ;;  %v1209_v45 = vmul.f32 %v4618_v6, %v4618_v6  ;;  %v2940_v21 = vpop.f32.mrb[4].mxu0  ;;  %v5048_v60 = vld [vmem:[#allocation24_spill] sm:$0xff] }
 0x1f9   : > { %v4630_v49 = vand.u32 4294901760, %v1210_v34  ;;  %v4633_v47 = vsub.f32 %v5046_v35, %v2940_v21  ;;  %v1177_v48 = vpop.f32.mrb[5].mxu0  ;;  %v4977_v3 = vand.u32 4294901760, %v4621_v56 }
 0x1fa   : > { %v4636_v23 = vand.u32 4294901760, %v1209_v45  ;;  %v4639_v41 = vsub.f32 %v5047_v46, %v1177_v48  ;;  %v4978_v52 = vand.u32 4294901760, %v4626_v38 }
 0x1fb   : > { %v4643_v59 = vsub.f32 %v1210_v34, %v4630_v49  ;;  %v1212_v12 = vmul.f32 %v4633_v47, %v4633_v47  ;;  %v1309_v14 = vsub.f32 %v4621_v56, %v4977_v3  ;;  %v5050_v34 = vld [vmem:[#allocation21_spill] sm:$0xff] }
 0x1fc   : > { %v4651_v17 = vsub.f32 %v1209_v45, %v4636_v23  ;;  %v1211_v20 = vmul.f32 %v4639_v41, %v4639_v41  ;;  %v2943_v39 = vpop.f32.mrb[6].mxu0  ;;  %v1299_v54 = vsub.f32 %v4626_v38, %v4978_v52  ;;  %v5052_v52 = vld [vmem:[#allocation23_spill] sm:$0xff] }
 0x1fd   : > { %v4658_v44 = vand.u32 4294901760, %v1212_v12  ;;  %v4661_v2 = vsub.f32 %v5048_v60, %v2943_v39  ;;  %v1189_v11 = vpop.f32.mrb[7].mxu0  ;;  %v4979_v25 = vand.u32 4294901760, %v4643_v59  ;;  %v1310_v3 = vand.u32 4294901760, %v1309_v14 }
 0x1fe   : > { %v4664_v5 = vand.u32 4294901760, %v1211_v20  ;;  %v4667_v45 = vsub.f32 %v5050_v34, %v1189_v11  ;;  %v1300_v21 = vand.u32 4294901760, %v1299_v54  ;;  %v4981_v35 = vand.u32 4294901760, %v4651_v17 }
 0x1ff   : > { %5049 = vst [vmem:[#allocation25_spill] sm:$0xff] %v4661_v2  ;;  %v4671_v48 = vsub.f32 %v1212_v12, %v4658_v44  ;;  %v1214_v46 = vmul.f32 %v4661_v2, %v4661_v2  ;;  %v1329_v39 = vsub.f32 %v4643_v59, %v4979_v25 }
 0x200   : > { %5051 = vst [vmem:[#allocation26_spill] sm:$0xff] %v4667_v45  ;;  %v4679_v60 = vsub.f32 %v1211_v20, %v4664_v5  ;;  %v1213_v11 = vmul.f32 %v4667_v45, %v4667_v45  ;;  %2976 = vmatprep.mubr.f32.mxu1 %v1300_v21  ;;  %v1319_v12 = vsub.f32 %v4651_v17, %v4981_v35 }
 0x201   : > { %v4686_v54 = vand.u32 4294901760, %v1214_v46  ;;  %2977 = vmatmul.mubr.f32.vlgmr.msra.gmra.mrb[0].mxu1 %v1310_v3  ;;  %v1348_v14 = vand.u32 4294901760, %v4671_v48  ;;  %v1330_v21 = vand.u32 4294901760, %v1329_v39 }
 0x202   : > { %v4689_v34 = vand.u32 4294901760, %v1213_v11  ;;  %3435 = vmatpush3.bf16.msra.mxu1 %v5052_v52  ;;  %v1320_v25 = vand.u32 4294901760, %v1319_v12  ;;  %v1338_v20 = vand.u32 4294901760, %v4679_v60 }
 0x203   : > { %v4694_v2 = vsub.f32 %v1214_v46, %v4686_v54  ;;  %3437 = vmatprep.subr.bf16.mxu1 %v4289_v24  ;;  %v1349_v35 = vsub.f32 %v4671_v48, %v1348_v14 }
 0x204   : > { %v4701_v3 = vsub.f32 %v1213_v11, %v4689_v34  ;;  %2979 = vmatprep.mubr.f32.mxu1 %v1320_v25  ;;  %v1339_v52 = vsub.f32 %v4679_v60, %v1338_v20 }
 0x205   : > { %2980 = vmatmul.mubr.f32.gmra.mrb[2].mxu1 %v1330_v21  ;;  %v1368_v12 = vand.u32 4294901760, %v4694_v2  ;;  %v1350_v45 = vand.u32 4294901760, %v1349_v35 }
 0x206   : > { %3439 = vmatpush3.bf16.msra.mxu1 %v4289_v24  ;;  %v1340_v46 = vand.u32 4294901760, %v1339_v52  ;;  %v1358_v39 = vand.u32 4294901760, %v4701_v3 }
 0x207   : > { %3441 = vmatprep.subr.bf16.mxu1 %v4299_v42  ;;  %v1369_v11 = vsub.f32 %v4694_v2, %v1368_v12 }
 0x208   : > { %2982 = vmatprep.mubr.f32.mxu1 %v1340_v46  ;;  %v1359_v25 = vsub.f32 %v4701_v3, %v1358_v39 }
 0x209   : > { %2983 = vmatmul.mubr.f32.gmra.mrb[4].mxu1 %v1350_v45  ;;  %v1370_v24 = vand.u32 4294901760, %v1369_v11 }
 0x20a   : > { %3443 = vmatpush3.bf16.msra.mxu1 %v4299_v42  ;;  %v1360_v21 = vand.u32 4294901760, %v1359_v25  ;;  %v5053_v42 = vand.u32 4294901760, %v4626_v38 }
 0x20b   : > { %3445 = vmatprep.subr.bf16.mxu1 %v4431_v57 }
 0x20c   : > { %2985 = vmatprep.mubr.f32.mxu1 %v1360_v21 }
 0x20d   : > { %2986 = vmatmul.mubr.f32.gmra.mrb[6].mxu1 %v1370_v24 }
 0x20e   : > { %3447 = vmatpush3.bf16.msra.mxu1 %v4431_v57  ;;  %3020 = vmatprep.mubr.f32.mxu1 %v4615_v30  ;;  %v5054_v57 = vand.u32 4294901760, %v4621_v56 }
 0x20f   : > { %3449 = vmatprep.subr.bf16.mxu1 %v4435_v55 }
 0x212   : > { %3451 = vmatpush3.bf16.msra.mxu1 %v4435_v55  ;;  %v5055_v55 = vand.u32 4294901760, %v4651_v17 }
 0x213   : > { %3453 = vmatprep.subr.bf16.mxu1 %v4440_v15 }
 0x216   : > { %3455 = vmatpush3.bf16.msra.mxu1 %v4440_v15  ;;  %v5056_v15 = vand.u32 4294901760, %v4643_v59 }
 0x217   : > { %3457 = vmatprep.subr.bf16.mxu1 %v4448_v43 }
 0x21a   : > { %3459 = vmatpush3.bf16.msra.mxu1 %v4448_v43 }
 0x21b   : > { %3461 = vmatprep.subr.bf16.mxu1 %v4452_v0 }
 0x21e   : > { %3463 = vmatpush3.bf16.msra.mxu1 %v4452_v0 }
 0x21f   : > { %3465 = vmatprep.subr.bf16.mxu1 %v4458_v16 }
 0x221   : > { %3021 = vmatmul.mubr.f32.vlgmr.msra.gmra.mrb[0].mxu1 %v4610_v19 }
 0x222   : > { %3023 = vmatprep.mubr.f32.mxu1 %v4636_v23  ;;  %3467 = vmatpush3.bf16.msra.mxu1 %v4458_v16 }
 0x223   : > { %3469 = vmatprep.subr.bf16.mxu1 %v4464_v31 }
 0x225   : > { %3024 = vmatmul.mubr.f32.gmra.mrb[2].mxu1 %v4630_v49 }
 0x226   : > { %3026 = vmatprep.mubr.f32.mxu1 %v4664_v5  ;;  %3471 = vmatpush3.bf16.msra.mxu1 %v4464_v31 }
 0x227   : > { %3473 = vmatprep.subr.bf16.mxu1 %v4472_v27 }
 0x229   : > { %3027 = vmatmul.mubr.f32.gmra.mrb[4].mxu1 %v4658_v44 }
 0x22a   : > { %3029 = vmatprep.mubr.f32.mxu1 %v4689_v34  ;;  %3475 = vmatpush3.bf16.msra.mxu1 %v4472_v27 }
 0x22b   : > { %3477 = vmatprep.subr.bf16.mxu1 %v4480_v28 }
 0x22d   : > { %3030 = vmatmul.mubr.f32.gmra.mrb[6].mxu1 %v4686_v54 }
 0x22e   : > { %3479 = vmatpush3.bf16.msra.mxu1 %v4480_v28  ;;  %3064 = vmatprep.mubr.f32.mxu1 %v4626_v38 }
 0x22f   : > { %3481 = vmatprep.subr.bf16.mxu1 %v4488_v32 }
 0x232   : > { %3483 = vmatpush3.bf16.msra.mxu1 %v4488_v32 }
 0x233   : > { %3485 = vmatprep.subr.bf16.mxu1 %v4496_v33 }
 0x236   : > { %3487 = vmatpush3.bf16.msra.mxu1 %v4496_v33 }
 0x237   : > { %3489 = vmatprep.subr.bf16.mxu1 %v4502_v36 }
 0x23a   : > { %3491 = vmatpush3.bf16.msra.mxu1 %v4502_v36 }
 0x23b   : > { %3493 = vmatprep.subr.bf16.mxu1 %v4508_v37 }
 0x23e   : > { %3495 = vmatpush3.bf16.msra.mxu1 %v4508_v37 }
 0x23f   : > { %3497 = vmatprep.subr.bf16.mxu1 %v4080_v10 }
 0x241   : > { %3065 = vmatmul.mubr.f32.vlgmr.msra.gmra.mrb[0].mxu1 %v4621_v56 }
 0x242   : > { %3067 = vmatprep.mubr.f32.mxu1 %v4651_v17  ;;  %3499 = vmatpush3.bf16.msra.mxu1 %v4080_v10 }
 0x243   : > { %3501 = vmatprep.subr.bf16.mxu1 %v4082_v13 }
 0x245   : > { %3068 = vmatmul.mubr.f32.gmra.mrb[2].mxu1 %v4643_v59 }
 0x246   : > { %3070 = vmatprep.mubr.f32.mxu1 %v4679_v60  ;;  %3503 = vmatpush3.bf16.msra.mxu1 %v4082_v13 }
 0x247   : > { %3505 = vmatprep.subr.bf16.mxu1 %v4099_v18 }
 0x249   : > { %3071 = vmatmul.mubr.f32.gmra.mrb[4].mxu1 %v4671_v48 }
 0x24a   : > { %3073 = vmatprep.mubr.f32.mxu1 %v4701_v3  ;;  %3507 = vmatpush3.bf16.msra.mxu1 %v4099_v18 }
 0x24b   : > { %3509 = vmatprep.subr.bf16.mxu1 %v5027_v51 }
 0x24d   : > { %3074 = vmatmul.mubr.f32.gmra.mrb[6].mxu1 %v4694_v2 }
 0x24e   : > { %3511 = vmatpush3.bf16.msra.mxu1 %v5027_v51  ;;  %3108 = vmatprep.mubr.f32.mxu1 %v5053_v42  ;;  %v2383_v42 = vld [vmem:[%s4933_s2] ss:$0 sm:$0xff] }
 0x24f   : > { %3513 = vmatprep.subr.bf16.mxu1 %v5029_v7 }
 0x252   : > { %3515 = vmatpush3.bf16.msra.mxu1 %v5029_v7 }
 0x253   : > { %3517 = vmatprep.subr.bf16.mxu1 %v5030_v62 }
 0x256   : > { %3519 = vmatpush3.bf16.msra.mxu1 %v5030_v62 }
 0x257   : > { %3521 = vmatprep.subr.bf16.mxu1 %v5031_v8 }
 0x25a   : > { %3523 = vmatpush3.bf16.msra.mxu1 %v5031_v8 }
 0x25b   : > { %3525 = vmatprep.subr.bf16.mxu1 %v5032_v26 }
 0x25e   : > { %3527 = vmatpush3.bf16.msra.mxu1 %v5032_v26 }
 0x25f   : > { %3529 = vmatprep.subr.bf16.mxu1 %v5033_v58 }
 0x261   : > { %3109 = vmatmul.mubr.f32.vlgmr.msra.gmra.mrb[0].mxu1 %v5054_v57 }
 0x262   : > { %3111 = vmatprep.mubr.f32.mxu1 %v5055_v55  ;;  %3531 = vmatpush3.bf16.msra.mxu1 %v5033_v58 }
 0x263   : > { %3533 = vmatprep.subr.bf16.mxu1 %v5036_v53 }
 0x265   : > { %3112 = vmatmul.mubr.f32.gmra.mrb[2].mxu1 %v5056_v15 }
 0x266   : > { %3114 = vmatprep.mubr.f32.mxu1 %v1338_v20  ;;  %3535 = vmatpush3.bf16.msra.mxu1 %v5036_v53 }
 0x267   : > { %3537 = vmatprep.subr.bf16.mxu1 %v4407_v9 }
 0x269   : > { %3115 = vmatmul.mubr.f32.gmra.mrb[4].mxu1 %v1348_v14 }
 0x26a   : > { %3117 = vmatprep.mubr.f32.mxu1 %v1358_v39  ;;  %3539 = vmatpush3.bf16.msra.mxu1 %v4407_v9 }
 0x26b   : > { %3541 = vmatprep.subr.bf16.mxu1 %v4412_v4 }
 0x26d   : > { %3118 = vmatmul.mubr.f32.gmra.mrb[6].mxu1 %v1368_v12 }
 0x26e   : > { %3543 = vmatpush3.bf16.msra.mxu1 %v4412_v4  ;;  %3152 = vmatprep.mubr.f32.mxu1 %v4615_v30 }
 0x26f   : > { %3545 = vmatprep.subr.bf16.mxu1 %v4414_v63 }
 0x272   : > { %3547 = vmatpush3.bf16.msra.mxu1 %v4414_v63 }
 0x273   : > { %3549 = vmatprep.subr.bf16.mxu1 %v4416_v61 }
 0x276   : > { %3551 = vmatpush3.bf16.msra.mxu1 %v4416_v61 }
 0x277   : > { %3553 = vmatprep.subr.bf16.mxu1 %v4420_v29 }
 0x27a   : > { %3555 = vmatpush3.bf16.msra.mxu1 %v4420_v29 }
 0x27b   : > { %3557 = vmatprep.subr.bf16.mxu1 %v4422_v22 }
 0x27e   : > { %3559 = vmatpush3.bf16.msra.mxu1 %v4422_v22 }
 0x27f   : > { %3561 = vmatprep.subr.bf16.mxu1 %v4080_v10 }
 0x281   : > { %3153 = vmatmul.mubr.f32.vlgmr.msra.gmra.mrb[0].mxu1 %v4610_v19 }
 0x282   : > { %3155 = vmatprep.mubr.f32.mxu1 %v4636_v23  ;;  %3563 = vmatpush3.bf16.msra.mxu1 %v4080_v10 }
 0x283   : > { %3565 = vmatprep.subr.bf16.mxu1 %v4082_v13 }
 0x285   : > { %3156 = vmatmul.mubr.f32.gmra.mrb[2].mxu1 %v4630_v49 }
 0x286   : > { %3158 = vmatprep.mubr.f32.mxu1 %v4664_v5  ;;  %3567 = vmatpush3.bf16.msra.mxu1 %v4082_v13 }
 0x287   : > { %3569 = vmatprep.subr.bf16.mxu1 %v4099_v18 }
 0x289   : > { %3159 = vmatmul.mubr.f32.gmra.mrb[4].mxu1 %v4658_v44 }
 0x28a   : > { %3161 = vmatprep.mubr.f32.mxu1 %v4689_v34  ;;  %3571 = vmatpush3.bf16.msra.mxu1 %v4099_v18 }
 0x28b   : > { %3573 = vmatprep.subr.bf16.mxu1 %v5027_v51 }
 0x28d   : > { %3162 = vmatmul.mubr.f32.gmra.mrb[6].mxu1 %v4686_v54 }
 0x28e   : > { %3575 = vmatpush3.bf16.msra.mxu1 %v5027_v51  ;;  %3196 = vmatprep.mubr.f32.mxu1 %v4615_v30 }
 0x28f   : > { %3577 = vmatprep.subr.bf16.mxu1 %v5029_v7 }
 0x292   : > { %3579 = vmatpush3.bf16.msra.mxu1 %v5029_v7 }
 0x293   : > { %3581 = vmatprep.subr.bf16.mxu1 %v5030_v62 }
 0x296   : > { %3583 = vmatpush3.bf16.msra.mxu1 %v5030_v62 }
 0x297   : > { %3585 = vmatprep.subr.bf16.mxu1 %v5031_v8 }
 0x29a   : > { %3587 = vmatpush3.bf16.msra.mxu1 %v5031_v8 }
 0x29b   : > { %3589 = vmatprep.subr.bf16.mxu1 %v5032_v26 }
 0x29e   : > { %3591 = vmatpush3.bf16.msra.mxu1 %v5032_v26 }
 0x2a1   : > { %3197 = vmatmul.mubr.f32.vlgmr.msra.gmra.mrb[0].mxu1 %v4610_v19 }
 0x2a2   : > { %3199 = vmatprep.mubr.f32.mxu1 %v4636_v23 }
 0x2a5   : > { %3200 = vmatmul.mubr.f32.gmra.mrb[2].mxu1 %v4630_v49 }
 0x2a6   : > { %3202 = vmatprep.mubr.f32.mxu1 %v4664_v5 }
 0x2a9   : > { %3203 = vmatmul.mubr.f32.gmra.mrb[4].mxu1 %v4658_v44 }
 0x2aa   : > { %3205 = vmatprep.mubr.f32.mxu1 %v4689_v34 }
 0x2ad   : > { %3206 = vmatmul.mubr.f32.gmra.mrb[6].mxu1 %v4686_v54 }
 0x374   : > { %v3198_v10 = vpop.f32.mrb[0].mxu1 }
 0x375   : > { %3733 = vrsqrt.f32 %v3198_v10  ;;  %v2111_v13 = vpop.f32.mrb[1].mxu1  ;;  %vm2166_vm0 = vcmp.eq.f32.partialorder %v3198_v10, inf  ;;  %vm2168_vm1 = vcmp.eq.f32.partialorder %v3198_v10, 0.0  ;;  %v2169_v0 = vand.u32 2147483648, %v3198_v10 }
 0x376   : > { %3735 = vrsqrt.f32 %v2111_v13  ;;  %vm2159_vm2 = vcmp.eq.f32.partialorder %v2111_v13, inf  ;;  %v2162_v28 = vand.u32 2147483648, %v2111_v13  ;;  %vm2161_vm3 = vcmp.eq.f32.partialorder %v2111_v13, 0.0 }
 0x378   : > { %v3201_v18 = vpop.f32.mrb[2].mxu1 }
 0x379   : > { %3737 = vrsqrt.f32 %v3201_v18  ;;  %v2123_v29 = vpop.f32.mrb[3].mxu1  ;;  %vm2180_vm4 = vcmp.eq.f32.partialorder %v3201_v18, inf  ;;  %vm2182_vm5 = vcmp.eq.f32.partialorder %v3201_v18, 0.0  ;;  %v2183_v26 = vand.u32 2147483648, %v3201_v18 }
 0x37a   : > { %3739 = vrsqrt.f32 %v2123_v29  ;;  %vm2173_vm6 = vcmp.eq.f32.partialorder %v2123_v29, inf  ;;  %v2176_v19 = vand.u32 2147483648, %v2123_v29  ;;  %vm2175_vm7 = vcmp.eq.f32.partialorder %v2123_v29, 0.0 }
 0x37c   : > { %v3204_v61 = vpop.f32.mrb[4].mxu1 }
 0x37d   : > { %3741 = vrsqrt.f32 %v3204_v61  ;;  %v2135_v9 = vpop.f32.mrb[5].mxu1  ;;  %vm2194_vm8 = vcmp.eq.f32.partialorder %v3204_v61, inf  ;;  %vm2196_vm9 = vcmp.eq.f32.partialorder %v3204_v61, 0.0  ;;  %v2197_v2 = vand.u32 2147483648, %v3204_v61 }
 0x37e   : > { %3743 = vrsqrt.f32 %v2135_v9  ;;  %vm2187_vm10 = vcmp.eq.f32.partialorder %v2135_v9, inf  ;;  %v2190_v35 = vand.u32 2147483648, %v2135_v9  ;;  %vm2189_vm11 = vcmp.eq.f32.partialorder %v2135_v9, 0.0 }
 0x37f   : > { %v3734_v4 = vpop.eup %3733 }
 0x380   : > { %v3736_v63 = vpop.eup %3735  ;;  %v2165_v22 = vmul.f32 %v3734_v4, %v3198_v10  ;;  %v4839_v43 = vpop.f32.mrb[6].mxu1 }
 0x381   : > { %v2158_v16 = vmul.f32 %v3736_v63, %v2111_v13  ;;  %3745 = vrsqrt.f32 %v4839_v43  ;;  %v4842_v31 = vpop.f32.mrb[7].mxu1  ;;  %vm2208_vm12 = vcmp.eq.f32.partialorder %v4839_v43, inf  ;;  %vm2210_vm13 = vcmp.eq.f32.partialorder %v4839_v43, 0.0 }
 0x382   : > { %v2167_v27 = vsel %vm2166_vm0, %v3198_v10, %v2165_v22  ;;  %3747 = vrsqrt.f32 %v4842_v31  ;;  %v2211_v12 = vand.u32 2147483648, %v4839_v43  ;;  %vm2201_vm14 = vcmp.eq.f32.partialorder %v4842_v31, inf }
 0x383   : > { %v3738_v32 = vpop.eup %3737  ;;  %v2170_v33 = vsel %vm2168_vm1, %v2169_v0, %v2167_v27  ;;  %v2160_v36 = vsel %vm2159_vm2, %v2111_v13, %v2158_v16  ;;  %v2204_v11 = vand.u32 2147483648, %v4842_v31  ;;  %vm2203_vm15 = vcmp.eq.f32.partialorder %v4842_v31, 0.0 }
 0x384   : > { %v3740_v37 = vpop.eup %3739  ;;  %v2214_v51 = vadd.f32 1e-06, %v2170_v33  ;;  %v2163_v7 = vsel %vm2161_vm3, %v2162_v28, %v2160_v36  ;;  %v2179_v62 = vmul.f32 %v3738_v32, %v3201_v18 }
 0x385   : > { %v2213_v8 = vadd.f32 1e-06, %v2163_v7  ;;  %v2172_v58 = vmul.f32 %v3740_v37, %v2123_v29 }
 0x386   : > { %3749 = vrcp.f32 %v2214_v51  ;;  %v2181_v53 = vsel %vm2180_vm4, %v3201_v18, %v2179_v62  ;;  %v2384_v18 = vld [vmem:[%s4934_s3] ss:$0 sm:$0xff]  ;;  %v5057_v62 = vld [vmem:[#allocation25_spill] sm:$0xff] }
 0x387   : > { %v3742_v30 = vpop.eup %3741  ;;  %3751 = vrcp.f32 %v2213_v8  ;;  %v2184_v56 = vsel %vm2182_vm5, %v2183_v26, %v2181_v53  ;;  %v2174_v38 = vsel %vm2173_vm6, %v2123_v29, %v2172_v58  ;;  %v5058_v58 = vld [vmem:[#allocation26_spill] sm:$0xff] }
 0x388   : > { %v3744_v49 = vpop.eup %3743  ;;  %v2216_v23 = vadd.f32 1e-06, %v2184_v56  ;;  %v2177_v59 = vsel %vm2175_vm7, %v2176_v19, %v2174_v38  ;;  %v2193_v17 = vmul.f32 %v3742_v30, %v3204_v61 }
 0x389   : > { %v2215_v44 = vadd.f32 1e-06, %v2177_v59  ;;  %v2186_v5 = vmul.f32 %v3744_v49, %v2135_v9 }
 0x38a   : > { %3753 = vrcp.f32 %v2216_v23  ;;  %v2195_v45 = vsel %vm2194_vm8, %v3204_v61, %v2193_v17 }
 0x38b   : > { %v3746_v48 = vpop.eup %3745  ;;  %3755 = vrcp.f32 %v2215_v44  ;;  %v2198_v60 = vsel %vm2196_vm9, %v2197_v2, %v2195_v45  ;;  %v2188_v54 = vsel %vm2187_vm10, %v2135_v9, %v2186_v5 }
 0x38c   : > { %v3748_v14 = vpop.eup %3747  ;;  %v2218_v34 = vadd.f32 1e-06, %v2198_v60  ;;  %v2191_v20 = vsel %vm2189_vm11, %v2190_v35, %v2188_v54  ;;  %v2207_v3 = vmul.f32 %v3746_v48, %v4839_v43 }
 0x38d   : > { %v2217_v52 = vadd.f32 1e-06, %v2191_v20  ;;  %v2200_v46 = vmul.f32 %v3748_v14, %v4842_v31 }
 0x38e   : > { %3757 = vrcp.f32 %v2218_v34  ;;  %v2209_v39 = vsel %vm2208_vm12, %v4839_v43, %v2207_v3 }
 0x38f   : > { %3759 = vrcp.f32 %v2217_v52  ;;  %v2212_v25 = vsel %vm2210_vm13, %v2211_v12, %v2209_v39  ;;  %v2202_v21 = vsel %vm2201_vm14, %v4842_v31, %v2200_v46 }
 0x390   : > { %v3750_v24 = vpop.eup %3749  ;;  %v2220_v57 = vadd.f32 1e-06, %v2212_v25  ;;  %v2205_v55 = vsel %vm2203_vm15, %v2204_v11, %v2202_v21 }
 0x391   : > { %v3752_v15 = vpop.eup %3751  ;;  %v2230_v10 = vmul.f32 %v3750_v24, %v4601_v40  ;;  %v2219_v13 = vadd.f32 1e-06, %v2205_v55 }
 0x392   : > { %v2229_v29 = vmul.f32 %v3752_v15, %v4604_v50  ;;  %3761 = vrcp.f32 %v2220_v57 }
 0x393   : > { %v2245_v61 = vmul.f32 %v2383_v42, %v2230_v10  ;;  %3763 = vrcp.f32 %v2219_v13 }
 0x394   : > { %v3754_v9 = vpop.eup %3753  ;;  %v2244_v4 = vmul.f32 %v2383_v42, %v2229_v29 }
 0x395   : > { %v3756_v63 = vpop.eup %3755  ;;  %v2260_v22 = vadd.f32 %v2384_v18, %v2245_v61  ;;  %v2232_v43 = vmul.f32 %v3754_v9, %v4613_v1 }
 0x396   : > { %v2259_v0 = vadd.f32 %v2384_v18, %v2244_v4  ;;  %v2231_v16 = vmul.f32 %v3756_v63, %v4618_v6 }
 0x397   : > { %2268 = vst [vmem:[%s4867_s9 + $0x8] sm:$0xff] %v2260_v22  ;;  %v2247_v40 = vmul.f32 %v2383_v42, %v2232_v43 }
 0x398   : > { %v3758_v50 = vpop.eup %3757  ;;  %2267 = vst [vmem:[%s4867_s9] sm:$0xff] %v2259_v0  ;;  %v2246_v31 = vmul.f32 %v2383_v42, %v2231_v16 }
 0x399   : > { %v3760_v27 = vpop.eup %3759  ;;  %v2262_v28 = vadd.f32 %v2384_v18, %v2247_v40  ;;  %v2234_v1 = vmul.f32 %v3758_v50, %v4633_v47 }
 0x39a   : > { %v2261_v6 = vadd.f32 %v2384_v18, %v2246_v31  ;;  %v2233_v32 = vmul.f32 %v3760_v27, %v4639_v41 }
 0x39b   : > { %2270 = vst [vmem:[%s4867_s9 + $0x18] sm:$0xff] %v2262_v28  ;;  %v2249_v33 = vmul.f32 %v2383_v42, %v2234_v1 }
 0x39c   : > { %v3762_v36 = vpop.eup %3761  ;;  %2269 = vst [vmem:[%s4867_s9 + $0x10] sm:$0xff] %v2261_v6  ;;  %v2248_v37 = vmul.f32 %v2383_v42, %v2233_v32 }
 0x39d   : > { %v3764_v51 = vpop.eup %3763  ;;  %v2264_v7 = vadd.f32 %v2384_v18, %v2249_v33  ;;  %v2236_v8 = vmul.f32 %v3762_v36, %v5057_v62 }
 0x39e   : > { %v2263_v26 = vadd.f32 %v2384_v18, %v2248_v37  ;;  %v2235_v53 = vmul.f32 %v3764_v51, %v5058_v58 }
 0x39f   : > { %2272 = vst [vmem:[%s4867_s9 + $0x28] sm:$0xff] %v2264_v7  ;;  %v2251_v47 = vmul.f32 %v2383_v42, %v2236_v8 }
 0x3a0   : > { %2271 = vst [vmem:[%s4867_s9 + $0x20] sm:$0xff] %v2263_v26  ;;  %v2250_v41 = vmul.f32 %v2383_v42, %v2235_v53 }
 0x3a1   : > { %v2266_v19 = vadd.f32 %v2384_v18, %v2251_v47 }
 0x3a2   : > { %v2265_v30 = vadd.f32 %v2384_v18, %v2250_v41 }
 0x3a3   : > { %2274 = vst [vmem:[%s4867_s9 + $0x38] sm:$0xff] %v2266_v19 }
 0x3a4   : > { %2273 = vst [vmem:[%s4867_s9 + $0x30] sm:$0xff] %v2265_v30 }
 0x3a5   : > { %3836 = shalt.err (!%p3833_p7)
}
 0x3a6   : > { %s3837_s5 = scalar_lea.hbm %s4884_s26, 1024  ;;  %s3841_s23 = scalar_lea.hbm %s4935_s4, 8192 }
 0x3a7   : > { %p3838_p9 = scmp.ne.s32.totalorder %s4884_s26, %s3837_s5  ;;  %p3842_p5 = scmp.lt.u32.totalorder %s4884_s26, %s4935_s4 }
 0x3a8   : > { %p3843_p10 = scmp.lt.u32.totalorder %s3841_s23, %s3837_s5  ;;  %p3845_p4 = scmp.lt.u32.totalorder %s3837_s5, %s4884_s26 }
 0x3a9   : > { %p3839_p1 = pnand %p3838_p9, %p4013_p12 }
 0x3aa   : > { %p3844_p2 = por %p3843_p10, %p3842_p5 }
 0x3ab   : > { %p3840_p0 = pneg %p3839_p1 }
 0x3ac   : > { %p3846_p6 = por %p3845_p4, %p3844_p2 }
 0x3ae   : > { %p3847_p8 = pnand %p3846_p6, %p3840_p0 }
 0x3b0   : > { %3850 = shalt.err (!%p3847_p8)
}
 0x3b1   : > { %s3900_s9 = smov 128   ;;  %s3901_s28 = smov 8  }
 0x3b2   : > { %3678 = dma.vmem_to_hbm [thread:$0]  (%p4013_p12), %s4886_s10, 1024, %s4884_s26, %s2276_s19, %s3900_s9, %s3900_s9, %s3901_s28  }
 0x3b3 PF: > { %p3695_p11 = scmp.ge.s32.totalorder %s3893_s18, 2  ;;  %s2304_s6 = sand.u32 1, %s3881_s15  }
 0x3b4   : > { %p5059_p13 = scmp.ne.s32.totalorder %s4984_s22, 0  ;;  %s2305_s7 = scalar_lea.sflag [#allocation4], %s2304_s6 }
 0x3b6   : > { %p3689_p3 = pnand %p3695_p11, %p5059_p13 }
 0x3b8   : > { %3876 = dma.done.wait (!%p3689_p3), %s2305_s7, 1024  }
 0x3b9   : > { %3878 = vsyncadd (!%p3689_p3), %s2305_s7, 4294966272  ;;  %p18_p7 = scmp.ge.s32.totalorder %s3980_s27, 10   ;;  %s5060_s15 = smov %s3885_s16 }
 0x3ba   : > { %s5061_s16 = smov %s3889_s17  ;;  %s5062_s17 = smov %s4009_s24 }
 0x3bb   : > { %s5063_s18 = smov %s3980_s27  ;;  %20 = sbr.rel (!%p18_p7) target bundleno = 6 (0x6), region = 85 }
 0x3c2   :  { %2310 = vsyncpa [#allocation3], 1 }
 0x3c3   :  { %2312 = vsyncpa [#allocation3 + $0x1], 1 }
 0x3c4   :  { %2313 = vsyncpa [#allocation6], 1 }
 0x3c5   :  { %2314 = vsyncpa [#allocation4], 1 }
 0x3c6   :  { %2316 = vsyncpa [#allocation4 + $0x1], 1 }

</bundles_post_ra>
